<compile_context>
chip_gen: v7x
topology: tpu7x:2x2x1
jax: 0.10.0
libtpu: 0.0.40
codegen_flags: <defaults>
</compile_context>

<pallas_src>
import functools

import jax
import jax.numpy as jnp
from jax.experimental import pallas as pl
from jax.experimental.pallas import tpu as pltpu


# ---------------------------------------------------------------------------
# Kernel
# ---------------------------------------------------------------------------
def _policy_kernel(x_ref, w1_ref, w2_ref, w3_ref, wh_ref,
                   mean_ref, logstd_ref, *, h1, h2, h3, action_dim):
    """Whole MLP in one block.

    x_ref : [Bblk, S+1]  f32   (last column is 1.0 -> layer-1 bias)
    w1_ref: [S+1,  h1]   bf16  (bias fused via the ones column)
    w2_ref: [h1+1, h2]   bf16  (last row = bias)
    w3_ref: [h2+1, h3]   bf16  (last row = bias)
    wh_ref: [h3+1, 2A]   bf16  (merged mean|log_std head, last row = bias)
    """
    x = x_ref[...].astype(jnp.bfloat16)

    # Layer 1: bias comes in through the ones column of x.
    h = jnp.dot(x, w1_ref[...], preferred_element_type=jnp.float32)
    h = jnp.maximum(h, 0.0)

    # Layer 2.
    h = jnp.dot(h.astype(jnp.bfloat16), w2_ref[:h1, :],
                preferred_element_type=jnp.float32) \
        + w2_ref[h1:h1 + 1, :].astype(jnp.float32)
    h = jnp.maximum(h, 0.0)

    # Layer 3.
    h = jnp.dot(h.astype(jnp.bfloat16), w3_ref[:h2, :],
                preferred_element_type=jnp.float32) \
        + w3_ref[h2:h2 + 1, :].astype(jnp.float32)
    h = jnp.maximum(h, 0.0)

    # Merged heads: one dot produces [mean | log_std].
    heads = jnp.dot(h.astype(jnp.bfloat16), wh_ref[:h3, :],
                    preferred_element_type=jnp.float32) \
        + wh_ref[h3:h3 + 1, :].astype(jnp.float32)

    mean_ref[...] = heads[:, :action_dim].astype(mean_ref.dtype)
    logstd_ref[...] = jnp.clip(heads[:, action_dim:], -20.0, 2.0).astype(logstd_ref.dtype)


# ---------------------------------------------------------------------------
# Wrapper
# ---------------------------------------------------------------------------
def gaussian_policy_forward(state, packed_params, *, batch_block=256):
    """Returns (mean, log_std) exactly as the PyTorch module's forward()."""
    w1a, w2a, w3a, wha = packed_params
    B, S = state.shape
    A = wha.shape[1] // 2
    h1, h2, h3 = w1a.shape[1], w2a.shape[1], w3a.shape[1]

    # Append a ones column so layer-1's bias is just another weight row.
    x_aug = jnp.concatenate(
        [state.astype(jnp.float32), jnp.ones((B, 1), jnp.float32)], axis=1)

    kernel = functools.partial(_policy_kernel, h1=h1, h2=h2, h3=h3, action_dim=A)

    param_bytes = sum(int(p.size) * p.dtype.itemsize for p in packed_params)

    def cost(n_rows):
        flops = 2 * n_rows * ((S + 1) * h1 + (h1 + 1) * h2
                              + (h2 + 1) * h3 + (h3 + 1) * 2 * A)
        io_bytes = n_rows * (S + 1) * 4 + 2 * n_rows * A * 4
        return pl.CostEstimate(flops=flops, transcendentals=0,
                               bytes_accessed=param_bytes + io_bytes)

    if B <= batch_block:
        # Single block, no grid: the whole problem fits in VMEM and a grid
        # would only add per-step overhead at rollout-sized batches.
        vmem = pl.BlockSpec(memory_space=pltpu.MemorySpace.VMEM)
        mean, log_std = pl.pallas_call(
            kernel,
            out_shape=(jax.ShapeDtypeStruct((B, A), jnp.float32),
                       jax.ShapeDtypeStruct((B, A), jnp.float32)),
            in_specs=[vmem] * 5,
            out_specs=(vmem, vmem),
            cost_estimate=cost(B),
        )(x_aug, w1a, w2a, w3a, wha)
        return mean, log_std

    # Large batch: block over rows, parallel semantics so v7x's two
    # TensorCores split the batch. Weights use a constant index_map, so they
    # are DMA'd once and kept resident across grid steps.
    nb = pl.cdiv(B, batch_block)
    padded_B = nb * batch_block
    if padded_B != B:
        x_aug = jnp.pad(x_aug, ((0, padded_B - B), (0, 0)))

    grid_spec = pltpu.PrefetchScalarGridSpec(
        num_scalar_prefetch=0,
        grid=(nb,),
        in_specs=[
            pl.BlockSpec((batch_block, S + 1), lambda i: (i, 0)),
            pl.BlockSpec(w1a.shape, lambda i: (0, 0)),
            pl.BlockSpec(w2a.shape, lambda i: (0, 0)),
            pl.BlockSpec(w3a.shape, lambda i: (0, 0)),
            pl.BlockSpec(wha.shape, lambda i: (0, 0)),
        ],
        out_specs=(
            pl.BlockSpec((batch_block, A), lambda i: (i, 0)),
            pl.BlockSpec((batch_block, A), lambda i: (i, 0)),
        ),
    )
    mean, log_std = pl.pallas_call(
        kernel,
        out_shape=(jax.ShapeDtypeStruct((padded_B, A), jnp.float32),
                   jax.ShapeDtypeStruct((padded_B, A), jnp.float32)),
        grid_spec=grid_spec,
        compiler_params=pltpu.CompilerParams(dimension_semantics=("parallel",)),
        cost_estimate=cost(padded_B),
    )(x_aug, w1a, w2a, w3a, wha)
    return mean[:B], log_std[:B]


# ---------------------------------------------------------------------------
# Parameter construction (mirrors the PyTorch module) + packing
# ---------------------------------------------------------------------------
def init_params(key, state_dim, action_dim, hidden_dims=(512, 512, 256)):
    """PyTorch-layout params: weights [out, in], biases [out] (f32)."""
    params = []
    in_dim = state_dim
    for hd in hidden_dims:
        key, kw, kb = jax.random.split(key, 3)
        bound = 1.0 / float(in_dim) ** 0.5
        w = jax.random.uniform(kw, (hd, in_dim), jnp.float32, -bound, bound)
        b = jax.random.uniform(kb, (hd,), jnp.float32, -bound, bound)
        params += [w, b]
        in_dim = hd
    for _ in range(2):  # mean head, log_std head (uniform +-0.003, as in torch code)
        key, kw, kb = jax.random.split(key, 3)
        w = jax.random.uniform(kw, (action_dim, in_dim), jnp.float32, -0.003, 0.003)
        b = jax.random.uniform(kb, (action_dim,), jnp.float32, -0.003, 0.003)
        params += [w, b]
    return tuple(params)


def pack_params(torch_params, dtype=jnp.bfloat16):
    """[out,in]/[out] PyTorch params -> 4 bias-fused, head-merged bf16 slabs."""
    (w1, b1, w2, b2, w3, b3, wm, bm, ws, bs) = torch_params

    def fuse(w, b):  # -> [in+1, out]
        return jnp.concatenate([w.T, b[None, :]], axis=0).astype(dtype)

    wh = jnp.concatenate([wm, ws], axis=0)  # [2A, in]
    bh = jnp.concatenate([bm, bs], axis=0)  # [2A]
    return (fuse(w1, b1), fuse(w2, b2), fuse(w3, b3), fuse(wh, bh))


def reference_forward(state, packed_params):
    """Pure-JAX reference with identical bf16 weight / activation casts."""
    w1a, w2a, w3a, wha = packed_params
    A = wha.shape[1] // 2
    h1, h2, h3 = w1a.shape[1], w2a.shape[1], w3a.shape[1]
    x = jnp.concatenate(
        [state, jnp.ones((state.shape[0], 1), state.dtype)], axis=1)
    h = jnp.maximum(jnp.dot(x.astype(jnp.bfloat16), w1a,
                            preferred_element_type=jnp.float32), 0.0)
    h = jnp.maximum(jnp.dot(h.astype(jnp.bfloat16), w2a[:h1],
                            preferred_element_type=jnp.float32)
                    + w2a[h1:h1 + 1].astype(jnp.float32), 0.0)
    h = jnp.maximum(jnp.dot(h.astype(jnp.bfloat16), w3a[:h2],
                            preferred_element_type=jnp.float32)
                    + w3a[h2:h2 + 1].astype(jnp.float32), 0.0)
    heads = jnp.dot(h.astype(jnp.bfloat16), wha[:h3],
                    preferred_element_type=jnp.float32) \
        + wha[h3:h3 + 1].astype(jnp.float32)
    return heads[:, :A], jnp.clip(heads[:, A:], -20.0, 2.0)


# TODO(synk): the `sample()` method (Normal.rsample / tanh-squash log-prob) is
# host-side distribution logic; only the deterministic forward() hot path is
# implemented as a kernel here.


if __name__ == "__main__":
    key = jax.random.PRNGKey(0)

    # BipedalWalker-like dims, kept small.
    batch, state_dim, action_dim = 8, 24, 4

    key, k_state, k_params = jax.random.split(key, 3)
    state = jax.random.normal(k_state, (batch, state_dim), dtype=jnp.float32)
    packed = pack_params(init_params(k_params, state_dim, action_dim))

    # --- Small-batch (single-block, no grid) path ---
    fwd = jax.jit(gaussian_policy_forward)
    mean, log_std = fwd(state, packed)
    jax.block_until_ready((mean, log_std))

    ref_mean, ref_log = reference_forward(state, packed)
    assert mean.shape == (batch, action_dim)
    assert log_std.shape == (batch, action_dim)
    assert bool(jnp.all(log_std >= -20.0)) and bool(jnp.all(log_std <= 2.0))
    assert bool(jnp.allclose(mean, ref_mean, atol=5e-2, rtol=5e-2))
    assert bool(jnp.allclose(log_std, ref_log, atol=5e-2, rtol=5e-2))

    # --- Large rollout batch (batch-blocked parallel grid) path ---
    big_B = 384
    big_state = jax.random.normal(jax.random.fold_in(key, 1),
                                  (big_B, state_dim), dtype=jnp.float32)
    fwd_big = jax.jit(functools.partial(gaussian_policy_forward, batch_block=128))
    mean_b, log_b = fwd_big(big_state, packed)
    jax.block_until_ready((mean_b, log_b))

    ref_mb, ref_lb = reference_forward(big_state, packed)
    assert mean_b.shape == (big_B, action_dim)
    assert log_b.shape == (big_B, action_dim)
    assert bool(jnp.allclose(mean_b, ref_mb, atol=5e-2, rtol=5e-2))
    assert bool(jnp.allclose(log_b, ref_lb, atol=5e-2, rtol=5e-2))

    print("KERNEL_OK")
</pallas_src>

<mosaic_0001>
module attributes {stable_mosaic.version = 11 : i64} {
  func.func @_policy_kernel(%arg0: memref<8x25xf32, #tpu.memory_space<vmem>>, %arg1: memref<25x512xbf16, #tpu.memory_space<vmem>>, %arg2: memref<513x512xbf16, #tpu.memory_space<vmem>>, %arg3: memref<513x256xbf16, #tpu.memory_space<vmem>>, %arg4: memref<257x8xbf16, #tpu.memory_space<vmem>>, %arg5: memref<8x4xf32, #tpu.memory_space<vmem>>, %arg6: memref<8x4xf32, #tpu.memory_space<vmem>>) attributes {dimension_semantics = [], scalar_prefetch = 0 : i64, scratch_operands = 0 : i64, tpu.core_type = #tpu.core_type<tc>} {
    %c0 = arith.constant 0 : index
    %c0_0 = arith.constant 0 : index
    %0 = vector.load %arg0[%c0, %c0_0] : memref<8x25xf32, #tpu.memory_space<vmem>>, vector<8x25xf32>
    %1 = arith.truncf %0 : vector<8x25xf32> to vector<8x25xbf16>
    %c0_1 = arith.constant 0 : index
    %c0_2 = arith.constant 0 : index
    %2 = vector.load %arg1[%c0_1, %c0_2] : memref<25x512xbf16, #tpu.memory_space<vmem>>, vector<25x512xbf16>
    %cst = arith.constant dense<0.000000e+00> : vector<8x512xf32>
    %3 = tpu.matmul %1, %2, %cst {dimension_numbers = #tpu.dot_dimension_numbers<[1], [0], [0], [1], [0, 0, 1, 1], [], []>} : vector<8x25xbf16>, vector<25x512xbf16>, vector<8x512xf32> -> vector<8x512xf32>
    %cst_3 = arith.constant 0.000000e+00 : f32
    %4 = vector.broadcast %cst_3 : f32 to vector<8x512xf32>
    %5 = arith.maximumf %3, %4 : vector<8x512xf32>
    %6 = arith.truncf %5 : vector<8x512xf32> to vector<8x512xbf16>
    %c0_4 = arith.constant 0 : index
    %c0_5 = arith.constant 0 : index
    %7 = vector.load %arg2[%c0_4, %c0_5] : memref<513x512xbf16, #tpu.memory_space<vmem>>, vector<512x512xbf16>
    %cst_6 = arith.constant dense<0.000000e+00> : vector<8x512xf32>
    %8 = tpu.matmul %6, %7, %cst_6 {dimension_numbers = #tpu.dot_dimension_numbers<[1], [0], [0], [1], [0, 0, 1, 1], [], []>} : vector<8x512xbf16>, vector<512x512xbf16>, vector<8x512xf32> -> vector<8x512xf32>
    %c512 = arith.constant 512 : index
    %c0_7 = arith.constant 0 : index
    %9 = vector.load %arg2[%c512, %c0_7] : memref<513x512xbf16, #tpu.memory_space<vmem>>, vector<1x512xbf16>
    %10 = arith.extf %9 : vector<1x512xbf16> to vector<1x512xf32>
    %11 = vector.broadcast %10 : vector<1x512xf32> to vector<8x512xf32>
    %12 = arith.addf %8, %11 : vector<8x512xf32>
    %cst_8 = arith.constant 0.000000e+00 : f32
    %13 = vector.broadcast %cst_8 : f32 to vector<8x512xf32>
    %14 = arith.maximumf %12, %13 : vector<8x512xf32>
    %15 = arith.truncf %14 : vector<8x512xf32> to vector<8x512xbf16>
    %c0_9 = arith.constant 0 : index
    %c0_10 = arith.constant 0 : index
    %16 = vector.load %arg3[%c0_9, %c0_10] : memref<513x256xbf16, #tpu.memory_space<vmem>>, vector<512x256xbf16>
    %cst_11 = arith.constant dense<0.000000e+00> : vector<8x256xf32>
    %17 = tpu.matmul %15, %16, %cst_11 {dimension_numbers = #tpu.dot_dimension_numbers<[1], [0], [0], [1], [0, 0, 1, 1], [], []>} : vector<8x512xbf16>, vector<512x256xbf16>, vector<8x256xf32> -> vector<8x256xf32>
    %c512_12 = arith.constant 512 : index
    %c0_13 = arith.constant 0 : index
    %18 = vector.load %arg3[%c512_12, %c0_13] : memref<513x256xbf16, #tpu.memory_space<vmem>>, vector<1x256xbf16>
    %19 = arith.extf %18 : vector<1x256xbf16> to vector<1x256xf32>
    %20 = vector.broadcast %19 : vector<1x256xf32> to vector<8x256xf32>
    %21 = arith.addf %17, %20 : vector<8x256xf32>
    %cst_14 = arith.constant 0.000000e+00 : f32
    %22 = vector.broadcast %cst_14 : f32 to vector<8x256xf32>
    %23 = arith.maximumf %21, %22 : vector<8x256xf32>
    %24 = arith.truncf %23 : vector<8x256xf32> to vector<8x256xbf16>
    %c0_15 = arith.constant 0 : index
    %c0_16 = arith.constant 0 : index
    %25 = vector.load %arg4[%c0_15, %c0_16] : memref<257x8xbf16, #tpu.memory_space<vmem>>, vector<256x8xbf16>
    %cst_17 = arith.constant dense<0.000000e+00> : vector<8x8xf32>
    %26 = tpu.matmul %24, %25, %cst_17 {dimension_numbers = #tpu.dot_dimension_numbers<[1], [0], [0], [1], [0, 0, 1, 1], [], []>} : vector<8x256xbf16>, vector<256x8xbf16>, vector<8x8xf32> -> vector<8x8xf32>
    %c256 = arith.constant 256 : index
    %c0_18 = arith.constant 0 : index
    %27 = vector.load %arg4[%c256, %c0_18] : memref<257x8xbf16, #tpu.memory_space<vmem>>, vector<1x8xbf16>
    %28 = arith.extf %27 : vector<1x8xbf16> to vector<1x8xf32>
    %29 = vector.broadcast %28 : vector<1x8xf32> to vector<8x8xf32>
    %30 = arith.addf %26, %29 : vector<8x8xf32>
    %31 = vector.extract_strided_slice %30 {offsets = [0, 0], sizes = [8, 4], strides = [1, 1]} : vector<8x8xf32> to vector<8x4xf32>
    %c0_19 = arith.constant 0 : index
    %c0_20 = arith.constant 0 : index
    %32 = vector.load %arg5[%c0_19, %c0_20] : memref<8x4xf32, #tpu.memory_space<vmem>>, vector<8x4xf32>
    tpu.vector_store %arg5[%c0_19, %c0_20], %31 {strides = array<i32>} : memref<8x4xf32, #tpu.memory_space<vmem>>, vector<8x4xf32>,
    %33 = vector.extract_strided_slice %30 {offsets = [0, 4], sizes = [8, 4], strides = [1, 1]} : vector<8x8xf32> to vector<8x4xf32>
    %cst_21 = arith.constant -2.000000e+01 : f32
    %cst_22 = arith.constant 2.000000e+00 : f32
    %34 = vector.broadcast %cst_21 : f32 to vector<8x4xf32>
    %35 = arith.maximumf %34, %33 : vector<8x4xf32>
    %36 = vector.broadcast %cst_22 : f32 to vector<8x4xf32>
    %37 = arith.minimumf %36, %35 : vector<8x4xf32>
    %c0_23 = arith.constant 0 : index
    %c0_24 = arith.constant 0 : index
    %38 = vector.load %arg6[%c0_23, %c0_24] : memref<8x4xf32, #tpu.memory_space<vmem>>, vector<8x4xf32>
    tpu.vector_store %arg6[%c0_23, %c0_24], %37 {strides = array<i32>} : memref<8x4xf32, #tpu.memory_space<vmem>>, vector<8x4xf32>,
    return
  }
}

</mosaic_0001>

<bundles_post_ra>
// kernel: gaussian_policy_forward.1
= control target key start
LH: loop header
LB: loop body
LE: loop exit
PB: predicated region body
PF: predicated region fallthrough
CT: control target
= control target key end

     0   :  { %12 = vsyncpa [#allocation3], 0  ;;  %s2647_s0 = inlined_call_operand.vmem [shape: f32[8,25], index: 0, kind: input, shape index: {}]   ;;  %s2648_s1 = inlined_call_operand.vmem [shape: bf16[25,512], index: 1, kind: input, shape index: {}]   ;;  %s2649_s2 = inlined_call_operand.hbm [shape: bf16[513,512], index: 2, kind: input, shape index: {}]   ;;  %s2650_s3 = inlined_call_operand.hbm [shape: bf16[513,256], index: 3, kind: input, shape index: {}]   ;;  %s2651_s4 = inlined_call_operand.vmem [shape: bf16[257,8], index: 4, kind: input, shape index: {}]   ;;  %s2652_s5 = inlined_call_operand.vmem [shape: f32[8,4], index: 5, kind: output, shape index: {0}]   ;;  %s2653_s6 = inlined_call_operand.vmem [shape: f32[8,4], index: 6, kind: output, shape index: {1}]  }
   0x1   :  { %13 = vsyncpa [#allocation5], 0  ;;  %s2472_s21 = smov [#allocation2]   ;;  %s2424_s25 = scalar_lea.hbm %s2649_s2, 16640 }
   0x2   :  { %s23_s22 = sshll.u32 %s2472_s21, 4  ;;  %p2425_p0 = scmp.ne.s32.totalorder %s2649_s2, %s2424_s25  ;;  %s24_s22 = int_to_ptr.vmem [resolvable:$true] %s23_s22 }
   0x3   :  { %p2428_p1 = scmp.lt.u32.totalorder %s2424_s25, %s2649_s2 }
   0x5   :  { %p2430_p2 = pnand %p2428_p1, %p2425_p0 }
   0x7   :  { %2433 = shalt.err (!%p2430_p2)
}
   0x8   :  { %s2434_s30 = scalar_lea.vmem %s24_s22, 16640  ;;  %p2439_p4 = scmp.lt.s32.totalorder %s24_s22, %s24_s22 }
   0x9   :  { %p2435_p3 = scmp.ne.s32.totalorder %s24_s22, %s2434_s30  ;;  %p2440_p5 = scmp.lt.s32.totalorder %s2434_s30, %s2434_s30 }
   0xb   :  { %p2441_p6 = por %p2440_p5, %p2439_p4 }
   0xd   :  { %p2442_p7 = pnand %p2441_p6, %p2435_p3 }
   0xf   :  { %2445 = shalt.err (!%p2442_p7)
}
  0x10   :  { %s2473_s7 = smov 256   ;;  %s2474_s8 = smov 16  }
  0x11   :  { %29 = dma.hbm_to_vmem [thread:$0]  %s2649_s2, 16640, %s24_s22, [#allocation3], %s2473_s7, %s2473_s7, %s2474_s8  }
  0x12   :  { %s2475_s11 = smov [#allocation4]   ;;  %s2446_s15 = scalar_lea.hbm %s2650_s3, 8320 }
  0x13   :  { %s35_s12 = sshll.u32 %s2475_s11, 4  ;;  %p2447_p8 = scmp.ne.s32.totalorder %s2650_s3, %s2446_s15  ;;  %s36_s12 = int_to_ptr.vmem [resolvable:$true] %s35_s12 }
  0x14   :  { %p2450_p9 = scmp.lt.u32.totalorder %s2446_s15, %s2650_s3 }
  0x16   :  { %p2452_p10 = pnand %p2450_p9, %p2447_p8 }
  0x18   :  { %2455 = shalt.err (!%p2452_p10)
}
  0x19   :  { %s2456_s20 = scalar_lea.vmem %s36_s12, 8320  ;;  %p2461_p12 = scmp.lt.s32.totalorder %s36_s12, %s36_s12 }
  0x1a   :  { %p2457_p11 = scmp.ne.s32.totalorder %s36_s12, %s2456_s20  ;;  %p2462_p13 = scmp.lt.s32.totalorder %s2456_s20, %s2456_s20 }
  0x1c   :  { %p2463_p0 = por %p2462_p13, %p2461_p12 }
  0x1e   :  { %p2464_p1 = pnand %p2463_p0, %p2457_p11 }
  0x20   :  { %2467 = shalt.err (!%p2464_p1)
}
  0x21   :  { %s2476_s2 = smov 128   ;;  %s2477_s21 = smov 8  }
  0x22   :  { %41 = dma.hbm_to_vmem [thread:$0]  %s2650_s3, 8320, %s36_s12, [#allocation5], %s2476_s2, %s2476_s2, %s2477_s21  }
  0x23   :  { %2468 = dma.done.wait [#allocation3], 16640  }
  0x24   :  { %2469 = vsyncadd [#allocation3], 4294950656 }
  0x25   :  { %2470 = dma.done.wait [#allocation5], 8320  }
  0x26   :  { %2471 = vsyncadd [#allocation5], 4294958976  ;;  %v2478_v0 = vmov 0   ;;  %vm101_vm0 = vcmask 1043456   ;;  %vm102_vm1 = vcmask 1044480   ;;  %v2479_v1 = vmov 65535  }
  0x27   :  { %149 = vmatprep.mubr.bf16.mxu0 %v2478_v0  ;;  %v103_v2 = vsel %vm101_vm0, 4294967295, %v2479_v1  ;;  %v2108_v3 = vld [vmem:[%s2648_s1 + $0x4] ss:$16 sps:$4 sm:$0xff]   ;;  %v2110_v4 = vld [vmem:[%s2648_s1] ss:$16 sps:$4 sm:$0xff]   ;;  %vm97_vm2 = vcmask 203776  }
  0x28   :  { %v104_v5 = vsel %vm102_vm1, %v103_v2, 0  ;;  %117 = vmatprep.subr.bf16.mxu0 %v2108_v3  ;;  %v2111_v6 = vld [vmem:[%s2648_s1 + $0x24] ss:$16 sps:$4 sm:$0x1f]   ;;  %v2116_v11 = vld [vmem:[%s2648_s1 + $0xc] ss:$16 sps:$4 sm:$0xff]  }
  0x29   :  { %v2113_v7 = vld [vmem:[%s2648_s1 + $0x20] ss:$16 sps:$4 sm:$0x1f]   ;;  %118 = vmatpush1.bf16.msra.mxu0 %v2110_v4  ;;  %v109_v9 = vand.u32 %v2111_v6, %v104_v5  ;;  %v2114_v12 = vld [vmem:[%s2648_s1 + $0x8] ss:$16 sps:$4 sm:$0xff]   ;;  %vm1824_vm3 = vcmask 31744  }
  0x2a   :  { %v51_v8 = vld [vmem:[%s2647_s0] sm:$0xff]  ;;  %v106_v10 = vand.u32 %v2113_v7, %v104_v5  ;;  %v2117_v13 = vld [vmem:[%s2648_s1 + $0x28] ss:$16 sps:$4 sm:$0x1f]   ;;  %s2480_s22 = smov 124  }
  0x2b   :  { %119 = vmatprep.subr.bf16.mxu0 %v109_v9  ;;  %v52_v14 = vpack.c.bf16 %v51_v8, %v51_v8  ;;  %v2119_v15 = vld [vmem:[%s2648_s1 + $0x2c] ss:$16 sps:$4 sm:$0x1f]   ;;  %v2120_v16 = vld [vmem:[#allocation2 + $0x4] ss:$16 sps:$4 sm:$0xff]   ;;  %v112_v22 = vand.u32 %v2117_v13, %v104_v5 }
  0x2c   :  { %v2122_v17 = vld [vmem:[#allocation2] ss:$16 sps:$4 sm:$0xff]   ;;  %v115_v18 = vand.u32 %v2119_v15, %v104_v5  ;;  %997 = vmatprep.subr.bf16.mxu1 %v2120_v16  ;;  %v2123_v19 = vld [vmem:[#allocation2 + $0x24] ss:$16 sps:$4 sm:$0xff]  }
  0x2d   :  { %120 = vmatpush1.bf16.msra.mxu0 %v106_v10  ;;  %998 = vmatpush1.bf16.msra.mxu1 %v2122_v17  ;;  %v2125_v20 = vld [vmem:[#allocation2 + $0x20] ss:$16 sps:$4 sm:$0xff]   ;;  %v2126_v21 = vld [vmem:[#allocation2 + $0x44] ss:$16 sps:$4 sm:$0xff]  }
  0x2e   :  { %158 = vmatprep.subr.bf16.mxu0 %v2116_v11  ;;  %999 = vmatprep.subr.bf16.mxu1 %v2123_v19  ;;  %v2131_v23 = vld [vmem:[#allocation2 + $0x204] ss:$16 sps:$4 sm:$0xff]   ;;  %v2128_v24 = vld [vmem:[#allocation2 + $0x40] ss:$16 sps:$4 sm:$0xff]  }
  0x2f   :  { %v2132_v25 = vld [vmem:[#allocation2 + $0x64] ss:$16 sps:$4 sm:$0xff]   ;;  %v2129_v26 = vld [vmem:[#allocation2 + $0x200] ss:$16 sps:$4 sm:$0xff]  }
  0x30   :  { %1851 = vmatmul.mubr.msk.bf16.vlgmr.msra.gmra.mrb[0].mxu0 %vm97_vm2, %v52_v14  ;;  %v2137_v27 = vld [vmem:[#allocation2 + $0x224] ss:$16 sps:$4 sm:$0xff]   ;;  %v2134_v28 = vld [vmem:[#allocation2 + $0x60] ss:$16 sps:$4 sm:$0xff]  }
  0x31   :  { %159 = vmatpush1.bf16.msra.mxu0 %v2114_v12  ;;  %190 = vmatprep.mubr.bf16.mxu0 %v2478_v0  ;;  %v2138_v29 = vld [vmem:[#allocation2 + $0x84] ss:$16 sps:$4 sm:$0xff]   ;;  %v2135_v30 = vld [vmem:[#allocation2 + $0x220] ss:$16 sps:$4 sm:$0xff]  }
  0x32   :  { %160 = vmatprep.subr.bf16.mxu0 %v115_v18  ;;  %1000 = vmatpush1.bf16.msra.mxu1 %v2125_v20  ;;  %v2143_v31 = vld [vmem:[#allocation2 + $0x244] ss:$16 sps:$4 sm:$0xff]   ;;  %v2140_v32 = vld [vmem:[#allocation2 + $0x80] ss:$16 sps:$4 sm:$0xff]  }
  0x33   :  { %1001 = vmatprep.subr.bf16.mxu1 %v2126_v21  ;;  %v2144_v33 = vld [vmem:[#allocation2 + $0xa4] ss:$16 sps:$4 sm:$0xff]   ;;  %v2141_v34 = vld [vmem:[#allocation2 + $0x240] ss:$16 sps:$4 sm:$0xff]  }
  0x34   :  { %v2149_v35 = vld [vmem:[#allocation2 + $0x264] ss:$16 sps:$4 sm:$0xff]   ;;  %v2146_v36 = vld [vmem:[#allocation2 + $0xa0] ss:$16 sps:$4 sm:$0xff]  }
  0x35   :  { %161 = vmatpush1.bf16.msra.mxu0 %v112_v22  ;;  %v2150_v37 = vld [vmem:[#allocation2 + $0xc4] ss:$16 sps:$4 sm:$0xff]   ;;  %v2147_v38 = vld [vmem:[#allocation2 + $0x260] ss:$16 sps:$4 sm:$0xff]  }
  0x36   :  { %1038 = vmatprep.subr.bf16.mxu0 %v2131_v23  ;;  %1002 = vmatpush1.bf16.msra.mxu1 %v2128_v24  ;;  %v2155_v39 = vld [vmem:[#allocation2 + $0x284] ss:$16 sps:$4 sm:$0xff]   ;;  %v2152_v40 = vld [vmem:[#allocation2 + $0xc0] ss:$16 sps:$4 sm:$0xff]  }
  0x37   :  { %1003 = vmatprep.subr.bf16.mxu1 %v2132_v25  ;;  %v2156_v41 = vld [vmem:[#allocation2 + $0xe4] ss:$16 sps:$4 sm:$0xff]   ;;  %v2153_v42 = vld [vmem:[#allocation2 + $0x280] ss:$16 sps:$4 sm:$0xff]  }
  0x38   :  { %1852 = vmatmul.mubr.msk.bf16.vlgmr.msra.gmra.mrb[4].mxu0 %vm97_vm2, %v52_v14  ;;  %v2161_v43 = vld [vmem:[#allocation2 + $0x2a4] ss:$16 sps:$4 sm:$0xff]   ;;  %v2158_v44 = vld [vmem:[#allocation2 + $0xe0] ss:$16 sps:$4 sm:$0xff]   ;;  %v2212_v14 = vld [vmem:[#allocation2 + $0xc] ss:$16 sps:$4 sm:$0xff]  }
  0x39   :  { %1039 = vmatpush1.bf16.msra.mxu0 %v2129_v26  ;;  %v2162_v45 = vld [vmem:[#allocation2 + $0x104] ss:$16 sps:$4 sm:$0xff]   ;;  %v2159_v46 = vld [vmem:[#allocation2 + $0x2a0] ss:$16 sps:$4 sm:$0xff]   ;;  %v2210_v26 = vld [vmem:[#allocation2 + $0x8] ss:$16 sps:$4 sm:$0xff]  }
  0x3a   :  { %1040 = vmatprep.subr.bf16.mxu0 %v2137_v27  ;;  %1004 = vmatpush1.bf16.msra.mxu1 %v2134_v28  ;;  %v2167_v47 = vld [vmem:[#allocation2 + $0x2c4] ss:$16 sps:$4 sm:$0xff]   ;;  %v2164_v48 = vld [vmem:[#allocation2 + $0x100] ss:$16 sps:$4 sm:$0xff]   ;;  %v2218_v28 = vld [vmem:[#allocation2 + $0x2c] ss:$16 sps:$4 sm:$0xff]  }
  0x3b   :  { %1005 = vmatprep.subr.bf16.mxu1 %v2138_v29  ;;  %v2168_v49 = vld [vmem:[#allocation2 + $0x124] ss:$16 sps:$4 sm:$0xff]   ;;  %v2165_v50 = vld [vmem:[#allocation2 + $0x2c0] ss:$16 sps:$4 sm:$0xff]  }
  0x3c   :  { %v2173_v51 = vld [vmem:[#allocation2 + $0x2e4] ss:$16 sps:$4 sm:$0xff]   ;;  %v2170_v52 = vld [vmem:[#allocation2 + $0x120] ss:$16 sps:$4 sm:$0xff]  }
  0x3d   :  { %1041 = vmatpush1.bf16.msra.mxu0 %v2135_v30  ;;  %v2171_v53 = vld [vmem:[#allocation2 + $0x2e0] ss:$16 sps:$4 sm:$0xff]   ;;  %v2174_v54 = vld [vmem:[#allocation2 + $0x144] ss:$16 sps:$4 sm:$0xff]  }
  0x3e   :  { %1042 = vmatprep.subr.bf16.mxu0 %v2143_v31  ;;  %1006 = vmatpush1.bf16.msra.mxu1 %v2140_v32  ;;  %v2176_v55 = vld [vmem:[#allocation2 + $0x140] ss:$16 sps:$4 sm:$0xff]   ;;  %v2179_v56 = vld [vmem:[#allocation2 + $0x304] ss:$16 sps:$4 sm:$0xff]   ;;  %v2216_v31 = vld [vmem:[#allocation2 + $0x28] ss:$16 sps:$4 sm:$0xff]  }
  0x3f   :  { %1007 = vmatprep.subr.bf16.mxu1 %v2144_v33  ;;  %v2180_v57 = vld [vmem:[#allocation2 + $0x164] ss:$16 sps:$4 sm:$0xff]   ;;  %v2177_v58 = vld [vmem:[#allocation2 + $0x300] ss:$16 sps:$4 sm:$0xff]  }
  0x40   :  { %v2185_v59 = vld [vmem:[#allocation2 + $0x324] ss:$16 sps:$4 sm:$0xff]   ;;  %v2182_v60 = vld [vmem:[#allocation2 + $0x160] ss:$16 sps:$4 sm:$0xff]  }
  0x41   :  { %1043 = vmatpush1.bf16.msra.mxu0 %v2141_v34  ;;  %v2186_v61 = vld [vmem:[#allocation2 + $0x184] ss:$16 sps:$4 sm:$0xff]   ;;  %v2183_v62 = vld [vmem:[#allocation2 + $0x320] ss:$16 sps:$4 sm:$0xff]   ;;  %v2224_v34 = vld [vmem:[#allocation2 + $0x4c] ss:$16 sps:$4 sm:$0xff]  }
  0x42   :  { %1044 = vmatprep.subr.bf16.mxu0 %v2149_v35  ;;  %1008 = vmatpush1.bf16.msra.mxu1 %v2146_v36  ;;  %v2191_v63 = vld [vmem:[#allocation2 + $0x344] ss:$16 sps:$4 sm:$0xff]   ;;  %v2188_v0 = vld [vmem:[#allocation2 + $0x180] ss:$16 sps:$4 sm:$0xff]  }
  0x43   :  { %1009 = vmatprep.subr.bf16.mxu1 %v2150_v37  ;;  %v2192_v1 = vld [vmem:[#allocation2 + $0x1a4] ss:$16 sps:$4 sm:$0xff]   ;;  %v2189_v2 = vld [vmem:[#allocation2 + $0x340] ss:$16 sps:$4 sm:$0xff]  }
  0x44   :  { %v2197_v3 = vld [vmem:[#allocation2 + $0x364] ss:$16 sps:$4 sm:$0xff]   ;;  %v2194_v4 = vld [vmem:[#allocation2 + $0x1a0] ss:$16 sps:$4 sm:$0xff]  }
  0x45   :  { %1045 = vmatpush1.bf16.msra.mxu0 %v2147_v38  ;;  %v2198_v5 = vld [vmem:[#allocation2 + $0x1c4] ss:$16 sps:$4 sm:$0xff]   ;;  %v2195_v6 = vld [vmem:[#allocation2 + $0x360] ss:$16 sps:$4 sm:$0xff]  }
  0x46   :  { %1046 = vmatprep.subr.bf16.mxu0 %v2155_v39  ;;  %1010 = vmatpush1.bf16.msra.mxu1 %v2152_v40  ;;  %v2203_v7 = vld [vmem:[#allocation2 + $0x384] ss:$16 sps:$4 sm:$0xff]   ;;  %v2200_v8 = vld [vmem:[#allocation2 + $0x1c0] ss:$16 sps:$4 sm:$0xff]   ;;  %v2222_v40 = vld [vmem:[#allocation2 + $0x48] ss:$16 sps:$4 sm:$0xff]  }
  0x47   :  { %1011 = vmatprep.subr.bf16.mxu1 %v2156_v41  ;;  %v2201_v9 = vld [vmem:[#allocation2 + $0x380] ss:$16 sps:$4 sm:$0xff]   ;;  %v2204_v10 = vld [vmem:[#allocation2 + $0x1e4] ss:$16 sps:$4 sm:$0xff]  }
  0x48   :  { %v2206_v11 = vld [vmem:[#allocation2 + $0x1e0] ss:$16 sps:$4 sm:$0xff]   ;;  %v2209_v12 = vld [vmem:[#allocation2 + $0x3a4] ss:$16 sps:$4 sm:$0xff]  }
  0x49   :  { %1047 = vmatpush1.bf16.msra.mxu0 %v2153_v42  ;;  %v2207_v13 = vld [vmem:[#allocation2 + $0x3a0] ss:$16 sps:$4 sm:$0xff]   ;;  %v2215_v15 = vld [vmem:[#allocation2 + $0x3c4] ss:$16 sps:$4 sm:$0xff]   ;;  %v2227_v42 = vld [vmem:[#allocation2 + $0x6c] ss:$16 sps:$4 sm:$0xff]  }
  0x4a   :  { %1048 = vmatprep.subr.bf16.mxu0 %v2161_v43  ;;  %1012 = vmatpush1.bf16.msra.mxu1 %v2158_v44  ;;  %v2213_v16 = vld [vmem:[#allocation2 + $0x3c0] ss:$16 sps:$4 sm:$0xff]   ;;  %v2221_v17 = vld [vmem:[#allocation2 + $0x3e4] ss:$16 sps:$4 sm:$0xff]   ;;  %v2225_v44 = vld [vmem:[#allocation2 + $0x68] ss:$16 sps:$4 sm:$0xff]  }
  0x4b   :  { %1013 = vmatprep.subr.bf16.mxu1 %v2162_v45  ;;  %v2219_v18 = vld [vmem:[#allocation2 + $0x3e0] ss:$16 sps:$4 sm:$0xff]   ;;  %v2314_v29 = vld [vmem:[#allocation4 + $0x4] ss:$8 sps:$4 sm:$0xff]   ;;  %v2317_v43 = vld [vmem:[#allocation4 + $0x14] ss:$8 sps:$4 sm:$0xff]  }
  0x4c   :  { %v2312_v41 = vld [vmem:[#allocation4] ss:$8 sps:$4 sm:$0xff]   ;;  %v2315_v45 = vld [vmem:[#allocation4 + $0x10] ss:$8 sps:$4 sm:$0xff]  }
  0x4d   :  { %1049 = vmatpush1.bf16.msra.mxu0 %v2159_v46  ;;  %v2230_v46 = vld [vmem:[#allocation2 + $0x8c] ss:$16 sps:$4 sm:$0xff]  }
  0x4e   :  { %1050 = vmatprep.subr.bf16.mxu0 %v2167_v47  ;;  %1014 = vmatpush1.bf16.msra.mxu1 %v2164_v48  ;;  %v2320_v47 = vld [vmem:[#allocation4 + $0x24] ss:$8 sps:$4 sm:$0xff]   ;;  %v2228_v48 = vld [vmem:[#allocation2 + $0x88] ss:$16 sps:$4 sm:$0xff]  }
  0x4f   :  { %1015 = vmatprep.subr.bf16.mxu1 %v2168_v49  ;;  %v2318_v49 = vld [vmem:[#allocation4 + $0x20] ss:$8 sps:$4 sm:$0xff]  }
  0x51   :  { %1051 = vmatpush1.bf16.msra.mxu0 %v2165_v50  ;;  %v2233_v50 = vld [vmem:[#allocation2 + $0xac] ss:$16 sps:$4 sm:$0xff]  }
  0x52   :  { %1052 = vmatprep.subr.bf16.mxu0 %v2173_v51  ;;  %1016 = vmatpush1.bf16.msra.mxu1 %v2170_v52  ;;  %v2323_v51 = vld [vmem:[#allocation4 + $0x34] ss:$8 sps:$4 sm:$0xff]   ;;  %v2231_v52 = vld [vmem:[#allocation2 + $0xa8] ss:$16 sps:$4 sm:$0xff]  }
  0x53   :  { %1017 = vmatprep.subr.bf16.mxu1 %v2174_v54  ;;  %v2236_v54 = vld [vmem:[#allocation2 + $0xcc] ss:$16 sps:$4 sm:$0xff]  }
  0x55   :  { %1053 = vmatpush1.bf16.msra.mxu0 %v2171_v53  ;;  %v2321_v53 = vld [vmem:[#allocation4 + $0x30] ss:$8 sps:$4 sm:$0xff]  }
  0x56   :  { %1054 = vmatprep.subr.bf16.mxu0 %v2179_v56  ;;  %1018 = vmatpush1.bf16.msra.mxu1 %v2176_v55  ;;  %v2326_v55 = vld [vmem:[#allocation4 + $0x44] ss:$8 sps:$4 sm:$0xff]   ;;  %v2234_v56 = vld [vmem:[#allocation2 + $0xc8] ss:$16 sps:$4 sm:$0xff]  }
  0x57   :  { %1019 = vmatprep.subr.bf16.mxu1 %v2180_v57  ;;  %v2324_v57 = vld [vmem:[#allocation4 + $0x40] ss:$8 sps:$4 sm:$0xff]  }
  0x59   :  { %1055 = vmatpush1.bf16.msra.mxu0 %v2177_v58  ;;  %v2239_v58 = vld [vmem:[#allocation2 + $0xec] ss:$16 sps:$4 sm:$0xff]  }
  0x5a   :  { %1056 = vmatprep.subr.bf16.mxu0 %v2185_v59  ;;  %1020 = vmatpush1.bf16.msra.mxu1 %v2182_v60  ;;  %v2329_v59 = vld [vmem:[#allocation4 + $0x54] ss:$8 sps:$4 sm:$0xff]   ;;  %v2237_v60 = vld [vmem:[#allocation2 + $0xe8] ss:$16 sps:$4 sm:$0xff]  }
  0x5b   :  { %1021 = vmatprep.subr.bf16.mxu1 %v2186_v61  ;;  %v2327_v61 = vld [vmem:[#allocation4 + $0x50] ss:$8 sps:$4 sm:$0xff]  }
  0x5d   :  { %1057 = vmatpush1.bf16.msra.mxu0 %v2183_v62  ;;  %v2242_v62 = vld [vmem:[#allocation2 + $0x10c] ss:$16 sps:$4 sm:$0xff]  }
  0x5e   :  { %1058 = vmatprep.subr.bf16.mxu0 %v2191_v63  ;;  %1022 = vmatpush1.bf16.msra.mxu1 %v2188_v0  ;;  %v2332_v63 = vld [vmem:[#allocation4 + $0x64] ss:$8 sps:$4 sm:$0xff]   ;;  %v2240_v0 = vld [vmem:[#allocation2 + $0x108] ss:$16 sps:$4 sm:$0xff]  }
  0x5f   :  { %1023 = vmatprep.subr.bf16.mxu1 %v2192_v1  ;;  %v2330_v1 = vld [vmem:[#allocation4 + $0x60] ss:$8 sps:$4 sm:$0xff]  }
  0x61   :  { %1059 = vmatpush1.bf16.msra.mxu0 %v2189_v2  ;;  %v2245_v2 = vld [vmem:[#allocation2 + $0x12c] ss:$16 sps:$4 sm:$0xff]  }
  0x62   :  { %1060 = vmatprep.subr.bf16.mxu0 %v2197_v3  ;;  %1024 = vmatpush1.bf16.msra.mxu1 %v2194_v4  ;;  %v2335_v3 = vld [vmem:[#allocation4 + $0x74] ss:$8 sps:$4 sm:$0xff]   ;;  %v2243_v4 = vld [vmem:[#allocation2 + $0x128] ss:$16 sps:$4 sm:$0xff]  }
  0x63   :  { %1025 = vmatprep.subr.bf16.mxu1 %v2198_v5  ;;  %v2333_v5 = vld [vmem:[#allocation4 + $0x70] ss:$8 sps:$4 sm:$0xff]  }
  0x65   :  { %1061 = vmatpush1.bf16.msra.mxu0 %v2195_v6  ;;  %v2248_v6 = vld [vmem:[#allocation2 + $0x14c] ss:$16 sps:$4 sm:$0xff]  }
  0x66   :  { %1062 = vmatprep.subr.bf16.mxu0 %v2203_v7  ;;  %1026 = vmatpush1.bf16.msra.mxu1 %v2200_v8  ;;  %v2338_v7 = vld [vmem:[#allocation4 + $0x84] ss:$8 sps:$4 sm:$0xff]   ;;  %v2246_v8 = vld [vmem:[#allocation2 + $0x148] ss:$16 sps:$4 sm:$0xff]  }
  0x67   :  { %1027 = vmatprep.subr.bf16.mxu1 %v2204_v10  ;;  %v2251_v10 = vld [vmem:[#allocation2 + $0x16c] ss:$16 sps:$4 sm:$0xff]  }
  0x69   :  { %1063 = vmatpush1.bf16.msra.mxu0 %v2201_v9  ;;  %v2336_v9 = vld [vmem:[#allocation4 + $0x80] ss:$8 sps:$4 sm:$0xff]  }
  0x6a   :  { %1028 = vmatpush1.bf16.msra.mxu1 %v2206_v11  ;;  %1064 = vmatprep.subr.bf16.mxu0 %v2209_v12  ;;  %v2341_v11 = vld [vmem:[#allocation4 + $0x94] ss:$8 sps:$4 sm:$0xff]   ;;  %v2249_v12 = vld [vmem:[#allocation2 + $0x168] ss:$16 sps:$4 sm:$0xff]  }
  0x6b   :  { %1079 = vmatprep.subr.bf16.mxu1 %v2212_v14  ;;  %v2254_v14 = vld [vmem:[#allocation2 + $0x18c] ss:$16 sps:$4 sm:$0xff]  }
  0x6d   :  { %1065 = vmatpush1.bf16.msra.mxu0 %v2207_v13  ;;  %v2339_v13 = vld [vmem:[#allocation4 + $0x90] ss:$8 sps:$4 sm:$0xff]  }
  0x6e   :  { %1066 = vmatprep.subr.bf16.mxu0 %v2215_v15  ;;  %v2344_v15 = vld [vmem:[#allocation4 + $0xa4] ss:$8 sps:$4 sm:$0xff]  }
  0x71   :  { %1067 = vmatpush1.bf16.msra.mxu0 %v2213_v16  ;;  %v2252_v16 = vld [vmem:[#allocation2 + $0x188] ss:$16 sps:$4 sm:$0xff]  }
  0x72   :  { %1068 = vmatprep.subr.bf16.mxu0 %v2221_v17  ;;  %v2342_v17 = vld [vmem:[#allocation4 + $0xa0] ss:$8 sps:$4 sm:$0xff]  }
  0x75   :  { %1069 = vmatpush1.bf16.msra.mxu0 %v2219_v18  ;;  %v2257_v18 = vld [vmem:[#allocation2 + $0x1ac] ss:$16 sps:$4 sm:$0xff]  }
  0x76   :  { %1564 = vmatprep.subr.bf16.mxu0 %v2314_v29  ;;  %v2269_v29 = vld [vmem:[#allocation2 + $0x22c] ss:$16 sps:$4 sm:$0xff]  }
 0x103   :  { %v151_v19 = vpop.f32.mrb[0].mxu0 }
 0x104   :  { %v199_v20 = vmax.f32 %v151_v19, 0.0  ;;  %v153_v21 = vpop.f32.mrb[1].mxu0  ;;  %v2347_v19 = vld [vmem:[#allocation4 + $0xb4] ss:$8 sps:$4 sm:$0xff]  }
 0x105   :  { %v200_v22 = vmax.f32 %v153_v21, 0.0  ;;  %v155_v23 = vpop.f32.mrb[2].mxu0  ;;  %v2345_v21 = vld [vmem:[#allocation4 + $0xb0] ss:$8 sps:$4 sm:$0xff]  }
 0x106   :  { %v156_v24 = vpop.f32.mrb[3].mxu0  ;;  %v2569_v27 = vpack.c.bf16 %v199_v20, %v199_v20  ;;  %v2255_v20 = vld [vmem:[#allocation2 + $0x1a8] ss:$16 sps:$4 sm:$0xff]  }
 0x107   :  { %v204_v25 = vpack.c.bf16 %v200_v22, %v200_v22  ;;  %v2260_v22 = vld [vmem:[#allocation2 + $0x1cc] ss:$16 sps:$4 sm:$0xff]   ;;  %v2258_v23 = vld [vmem:[#allocation2 + $0x1c8] ss:$16 sps:$4 sm:$0xff]  }
 0x108   :  { %v2263_v24 = vld [vmem:[#allocation2 + $0x1ec] ss:$16 sps:$4 sm:$0xff]  }
 0x109   :  { %1029 = vmatprep.mubr.bf16.mxu1 %v204_v25 }
 0x10a   :  { %1030 = vmatmul.mubr.bf16.vlgmr.msra.gmra.mrb[0].mxu1 %v2569_v27 }
 0x10b   :  { %1080 = vmatpush1.bf16.msra.mxu1 %v2210_v26  ;;  %v192_v30 = vpop.f32.mrb[4].mxu0  ;;  %1111 = vmatprep.mubr.bf16.mxu1 %v204_v25  ;;  %v2261_v25 = vld [vmem:[#allocation2 + $0x1e8] ss:$16 sps:$4 sm:$0xff]   ;;  %v2266_v26 = vld [vmem:[#allocation2 + $0x20c] ss:$16 sps:$4 sm:$0xff]  }
 0x10c   :  { %v201_v32 = vmax.f32 %v192_v30, 0.0  ;;  %v194_v33 = vpop.f32.mrb[5].mxu0  ;;  %1081 = vmatprep.subr.bf16.mxu1 %v2218_v28  ;;  %v2264_v28 = vld [vmem:[#allocation2 + $0x208] ss:$16 sps:$4 sm:$0xff]  }
 0x10d   :  { %v202_v35 = vmax.f32 %v194_v33, 0.0  ;;  %v196_v36 = vpop.f32.mrb[6].mxu0  ;;  %v2267_v30 = vld [vmem:[#allocation2 + $0x228] ss:$16 sps:$4 sm:$0xff]   ;;  %v2275_v33 = vld [vmem:[#allocation2 + $0x26c] ss:$16 sps:$4 sm:$0xff]  }
 0x10e   :  { %v2572_v37 = vpack.c.bf16 %v201_v32, %v201_v32  ;;  %v197_v38 = vpop.f32.mrb[7].mxu0  ;;  %v2270_v32 = vld [vmem:[#allocation2 + $0x248] ss:$16 sps:$4 sm:$0xff]  }
 0x10f   :  { %v2574_v39 = vpack.c.bf16 %v202_v35, %v202_v35  ;;  %1082 = vmatpush1.bf16.msra.mxu1 %v2216_v31  ;;  %v2272_v31 = vld [vmem:[#allocation2 + $0x24c] ss:$16 sps:$4 sm:$0xff]   ;;  %v2276_v36 = vld [vmem:[#allocation2 + $0x288] ss:$16 sps:$4 sm:$0xff]  }
 0x110   :  { %1083 = vmatprep.subr.bf16.mxu1 %v2224_v34  ;;  %v2273_v34 = vld [vmem:[#allocation2 + $0x268] ss:$16 sps:$4 sm:$0xff]   ;;  %v2278_v35 = vld [vmem:[#allocation2 + $0x28c] ss:$16 sps:$4 sm:$0xff]  }
 0x111   :  { %1070 = vmatprep.mubr.bf16.mxu0 %v2574_v39  ;;  %v2281_v38 = vld [vmem:[#allocation2 + $0x2ac] ss:$16 sps:$4 sm:$0xff]  }
 0x112   :  { %1071 = vmatmul.mubr.bf16.vlgmr.msra.gmra.mrb[8].mxu0 %v2572_v37 }
 0x113   :  { %1084 = vmatpush1.bf16.msra.mxu1 %v2222_v40  ;;  %1565 = vmatpush1.bf16.msra.mxu0 %v2312_v41  ;;  %v2284_v40 = vld [vmem:[#allocation2 + $0x2cc] ss:$16 sps:$4 sm:$0xff]   ;;  %v2348_v41 = vld [vmem:[#allocation4 + $0xc0] ss:$8 sps:$4 sm:$0xff]  }
 0x114   :  { %1085 = vmatprep.subr.bf16.mxu1 %v2227_v42  ;;  %1566 = vmatprep.subr.bf16.mxu0 %v2317_v43  ;;  %v2282_v42 = vld [vmem:[#allocation2 + $0x2c8] ss:$16 sps:$4 sm:$0xff]   ;;  %v2287_v43 = vld [vmem:[#allocation2 + $0x2ec] ss:$16 sps:$4 sm:$0xff]  }
 0x117   :  { %1086 = vmatpush1.bf16.msra.mxu1 %v2225_v44  ;;  %1567 = vmatpush1.bf16.msra.mxu0 %v2315_v45  ;;  %v2351_v44 = vld [vmem:[#allocation4 + $0xd0] ss:$8 sps:$4 sm:$0xff]   ;;  %v2353_v45 = vld [vmem:[#allocation4 + $0xd4] ss:$8 sps:$4 sm:$0xff]  }
 0x118   :  { %1087 = vmatprep.subr.bf16.mxu1 %v2230_v46  ;;  %1568 = vmatprep.subr.bf16.mxu0 %v2320_v47  ;;  %v2285_v46 = vld [vmem:[#allocation2 + $0x2e8] ss:$16 sps:$4 sm:$0xff]   ;;  %v2290_v47 = vld [vmem:[#allocation2 + $0x30c] ss:$16 sps:$4 sm:$0xff]  }
 0x11b   :  { %1088 = vmatpush1.bf16.msra.mxu1 %v2228_v48  ;;  %1569 = vmatpush1.bf16.msra.mxu0 %v2318_v49  ;;  %v2356_v48 = vld [vmem:[#allocation4 + $0xe4] ss:$8 sps:$4 sm:$0xff]   ;;  %v2354_v49 = vld [vmem:[#allocation4 + $0xe0] ss:$8 sps:$4 sm:$0xff]  }
 0x11c   :  { %1089 = vmatprep.subr.bf16.mxu1 %v2233_v50  ;;  %1570 = vmatprep.subr.bf16.mxu0 %v2323_v51  ;;  %v2288_v50 = vld [vmem:[#allocation2 + $0x308] ss:$16 sps:$4 sm:$0xff]   ;;  %v2293_v51 = vld [vmem:[#allocation2 + $0x32c] ss:$16 sps:$4 sm:$0xff]  }
 0x11f   :  { %1090 = vmatpush1.bf16.msra.mxu1 %v2231_v52  ;;  %1571 = vmatpush1.bf16.msra.mxu0 %v2321_v53  ;;  %v2359_v52 = vld [vmem:[#allocation4 + $0xf4] ss:$8 sps:$4 sm:$0xff]   ;;  %v2357_v53 = vld [vmem:[#allocation4 + $0xf0] ss:$8 sps:$4 sm:$0xff]  }
 0x120   :  { %1091 = vmatprep.subr.bf16.mxu1 %v2236_v54  ;;  %1572 = vmatprep.subr.bf16.mxu0 %v2326_v55  ;;  %v2291_v54 = vld [vmem:[#allocation2 + $0x328] ss:$16 sps:$4 sm:$0xff]   ;;  %v2296_v55 = vld [vmem:[#allocation2 + $0x34c] ss:$16 sps:$4 sm:$0xff]  }
 0x123   :  { %1092 = vmatpush1.bf16.msra.mxu1 %v2234_v56  ;;  %1573 = vmatpush1.bf16.msra.mxu0 %v2324_v57  ;;  %v2362_v56 = vld [vmem:[#allocation4 + $0x104] ss:$8 sps:$4 sm:$0xff]   ;;  %v2294_v57 = vld [vmem:[#allocation2 + $0x348] ss:$16 sps:$4 sm:$0xff]  }
 0x124   :  { %1093 = vmatprep.subr.bf16.mxu1 %v2239_v58  ;;  %1574 = vmatprep.subr.bf16.mxu0 %v2329_v59  ;;  %v2299_v58 = vld [vmem:[#allocation2 + $0x36c] ss:$16 sps:$4 sm:$0xff]   ;;  %v2297_v59 = vld [vmem:[#allocation2 + $0x368] ss:$16 sps:$4 sm:$0xff]  }
 0x127   :  { %1094 = vmatpush1.bf16.msra.mxu1 %v2237_v60  ;;  %1575 = vmatpush1.bf16.msra.mxu0 %v2327_v61  ;;  %v2302_v60 = vld [vmem:[#allocation2 + $0x38c] ss:$16 sps:$4 sm:$0xff]   ;;  %v2300_v61 = vld [vmem:[#allocation2 + $0x388] ss:$16 sps:$4 sm:$0xff]  }
 0x128   :  { %1095 = vmatprep.subr.bf16.mxu1 %v2242_v62  ;;  %1576 = vmatprep.subr.bf16.mxu0 %v2332_v63  ;;  %v2305_v62 = vld [vmem:[#allocation2 + $0x3ac] ss:$16 sps:$4 sm:$0xff]   ;;  %v2303_v63 = vld [vmem:[#allocation2 + $0x3a8] ss:$16 sps:$4 sm:$0xff]  }
 0x12b   :  { %1096 = vmatpush1.bf16.msra.mxu1 %v2240_v0  ;;  %1577 = vmatpush1.bf16.msra.mxu0 %v2330_v1  ;;  %v2308_v0 = vld [vmem:[#allocation2 + $0x3cc] ss:$16 sps:$4 sm:$0xff]   ;;  %v2306_v1 = vld [vmem:[#allocation2 + $0x3c8] ss:$16 sps:$4 sm:$0xff]  }
 0x12c   :  { %1097 = vmatprep.subr.bf16.mxu1 %v2245_v2  ;;  %1578 = vmatprep.subr.bf16.mxu0 %v2335_v3  ;;  %v2311_v2 = vld [vmem:[#allocation2 + $0x3ec] ss:$16 sps:$4 sm:$0xff]   ;;  %v2309_v3 = vld [vmem:[#allocation2 + $0x3e8] ss:$16 sps:$4 sm:$0xff]  }
 0x12f   :  { %1098 = vmatpush1.bf16.msra.mxu1 %v2243_v4  ;;  %1579 = vmatpush1.bf16.msra.mxu0 %v2333_v5  ;;  %v341_v4 = vlaneseq }
 0x130   :  { %1099 = vmatprep.subr.bf16.mxu1 %v2248_v6  ;;  %1580 = vmatprep.subr.bf16.mxu0 %v2338_v7  ;;  %v335_v6 = vld [vmem:[#allocation2 + $0x400] sm:$0x11] }
 0x131   :  { %v342_v5 = vshrl.u32 %v341_v4, 7  ;;  %v337_v7 = vunpack.c.l.bf16 %v335_v6  ;;  %v2402_v4 = vld [vmem:[#allocation4 + $0x1e0] ss:$8 sps:$4 sm:$0xff]  }
 0x133   :  { %1100 = vmatpush1.bf16.msra.mxu1 %v2246_v8  ;;  %1581 = vmatpush1.bf16.msra.mxu0 %v2336_v9  ;;  %v2581_v8 = vsub.s32 0, %v342_v5  ;;  %v2407_v5 = vld [vmem:[#allocation4 + $0x1f4] ss:$8 sps:$4 sm:$0xff]  }
 0x134   :  { %1101 = vmatprep.subr.bf16.mxu1 %v2251_v10  ;;  %1582 = vmatprep.subr.bf16.mxu0 %v2341_v11  ;;  %v338_v10 = vunpack.c.h.bf16 %v335_v6  ;;  %v2405_v6 = vld [vmem:[#allocation4 + $0x1f0] ss:$8 sps:$4 sm:$0xff]  }
 0x137   :  { %1102 = vmatpush1.bf16.msra.mxu1 %v2249_v12  ;;  %1583 = vmatpush1.bf16.msra.mxu0 %v2339_v13  ;;  %v344_v13 = vrot.slane %v337_v7, %v2581_v8  ;;  %v336_v7 = vld [vmem:[#allocation2 + $0x408] sm:$0x11] }
 0x138   :  { %1103 = vmatprep.subr.bf16.mxu1 %v2254_v14  ;;  %1584 = vmatprep.subr.bf16.mxu0 %v2344_v15  ;;  %v348_v15 = vrot.slane %v338_v10, %v2581_v8  ;;  %v340_v10 = vunpack.c.h.bf16 %v336_v7 }
 0x13b   :  { %1104 = vmatpush1.bf16.msra.mxu1 %v2252_v16  ;;  %1585 = vmatpush1.bf16.msra.mxu0 %v2342_v17 }
 0x13c   :  { %1105 = vmatprep.subr.bf16.mxu1 %v2257_v18  ;;  %1586 = vmatprep.subr.bf16.mxu0 %v2347_v19 }
 0x13f   :  { %1106 = vmatpush1.bf16.msra.mxu1 %v2255_v20  ;;  %1587 = vmatpush1.bf16.msra.mxu0 %v2345_v21  ;;  %v2408_v20 = vld [vmem:[%s2651_s4 + $0x40] sm:$0xff]  }
 0x140   :  { %1107 = vmatprep.subr.bf16.mxu1 %v2260_v22  ;;  %v2409_v21 = vld [vmem:[%s2651_s4] sm:$0xff]   ;;  %v2410_v22 = vld [vmem:[%s2651_s4 + $0x48] sm:$0xff]  }
 0x143   :  { %1108 = vmatpush1.bf16.msra.mxu1 %v2258_v23 }
 0x144   :  { %1109 = vmatprep.subr.bf16.mxu1 %v2263_v24 }
 0x147   :  { %1110 = vmatpush1.bf16.msra.mxu1 %v2261_v25 }
 0x148   :  { %1120 = vmatprep.subr.bf16.mxu1 %v2266_v26 }
 0x14a   :  { %1112 = vmatmul.mubr.bf16.vlgmr.msra.gmra.mrb[4].mxu1 %v2569_v27  ;;  %v2279_v27 = vld [vmem:[#allocation2 + $0x2a8] ss:$16 sps:$4 sm:$0xff]  }
 0x14b   :  { %1121 = vmatpush1.bf16.msra.mxu1 %v2264_v28  ;;  %1152 = vmatprep.mubr.bf16.mxu1 %v2574_v39  ;;  %v2350_v39 = vld [vmem:[#allocation4 + $0xc4] ss:$8 sps:$4 sm:$0xff]  }
 0x14c   :  { %1122 = vmatprep.subr.bf16.mxu1 %v2269_v29  ;;  %1588 = vmatprep.subr.bf16.mxu0 %v2350_v39  ;;  %v2411_v29 = vld [vmem:[%s2651_s4 + $0x8] sm:$0xff]   ;;  %v2416_v39 = vld [vmem:[%s2651_s4 + $0x60] sm:$0xff]  }
 0x14d   :  { %1589 = vmatpush1.bf16.msra.mxu0 %v2348_v41  ;;  %v2366_v41 = vld [vmem:[#allocation4 + $0x120] ss:$8 sps:$4 sm:$0xff]  }
 0x14e   :  { %1590 = vmatprep.subr.bf16.mxu0 %v2353_v45  ;;  %v2369_v45 = vld [vmem:[#allocation4 + $0x130] ss:$8 sps:$4 sm:$0xff]  }
 0x14f   :  { %1123 = vmatpush1.bf16.msra.mxu1 %v2267_v30  ;;  %v2412_v30 = vld [vmem:[%s2651_s4 + $0x50] sm:$0xff]  }
 0x150   :  { %1124 = vmatprep.subr.bf16.mxu1 %v2272_v31 }
 0x151   :  { %1591 = vmatpush1.bf16.msra.mxu0 %v2351_v44  ;;  %v2418_v44 = vld [vmem:[%s2651_s4 + $0x68] sm:$0xff]  }
 0x152   :  { %1592 = vmatprep.subr.bf16.mxu0 %v2356_v48  ;;  %v2372_v48 = vld [vmem:[#allocation4 + $0x140] ss:$8 sps:$4 sm:$0xff]  }
 0x153   :  { %1125 = vmatpush1.bf16.msra.mxu1 %v2270_v32  ;;  %v2360_v32 = vld [vmem:[#allocation4 + $0x100] ss:$8 sps:$4 sm:$0xff]  }
 0x154   :  { %1126 = vmatprep.subr.bf16.mxu1 %v2275_v33 }
 0x155   :  { %1593 = vmatpush1.bf16.msra.mxu0 %v2354_v49  ;;  %v2377_v49 = vld [vmem:[#allocation4 + $0x154] ss:$8 sps:$4 sm:$0xff]  }
 0x156   :  { %1594 = vmatprep.subr.bf16.mxu0 %v2359_v52  ;;  %v2378_v52 = vld [vmem:[#allocation4 + $0x160] ss:$8 sps:$4 sm:$0xff]  }
 0x157   :  { %1127 = vmatpush1.bf16.msra.mxu1 %v2273_v34  ;;  %v2365_v34 = vld [vmem:[#allocation4 + $0x114] ss:$8 sps:$4 sm:$0xff]  }
 0x158   :  { %1128 = vmatprep.subr.bf16.mxu1 %v2278_v35  ;;  %v2413_v35 = vld [vmem:[%s2651_s4 + $0x10] sm:$0xff]  }
 0x159   :  { %1595 = vmatpush1.bf16.msra.mxu0 %v2357_v53  ;;  %v2383_v53 = vld [vmem:[#allocation4 + $0x174] ss:$8 sps:$4 sm:$0xff]  }
 0x15a   :  { %1605 = vmatprep.subr.bf16.mxu0 %v2362_v56  ;;  %v2384_v56 = vld [vmem:[#allocation4 + $0x180] ss:$8 sps:$4 sm:$0xff]  }
 0x15b   :  { %1129 = vmatpush1.bf16.msra.mxu1 %v2276_v36  ;;  %v2414_v36 = vld [vmem:[%s2651_s4 + $0x58] sm:$0xff]  }
 0x15c   :  { %1130 = vmatprep.subr.bf16.mxu1 %v2281_v38  ;;  %v2363_v38 = vld [vmem:[#allocation4 + $0x110] ss:$8 sps:$4 sm:$0xff]  }
 0x15f   :  { %1131 = vmatpush1.bf16.msra.mxu1 %v2279_v27  ;;  %v2368_v27 = vld [vmem:[#allocation4 + $0x124] ss:$8 sps:$4 sm:$0xff]  }
 0x160   :  { %1132 = vmatprep.subr.bf16.mxu1 %v2284_v40  ;;  %v2415_v40 = vld [vmem:[%s2651_s4 + $0x18] sm:$0xff]  }
 0x163   :  { %1133 = vmatpush1.bf16.msra.mxu1 %v2282_v42  ;;  %v2371_v42 = vld [vmem:[#allocation4 + $0x134] ss:$8 sps:$4 sm:$0xff]  }
 0x164   :  { %1134 = vmatprep.subr.bf16.mxu1 %v2287_v43  ;;  %v2417_v43 = vld [vmem:[%s2651_s4 + $0x20] sm:$0xff]  }
 0x167   :  { %1135 = vmatpush1.bf16.msra.mxu1 %v2285_v46  ;;  %v2374_v46 = vld [vmem:[#allocation4 + $0x144] ss:$8 sps:$4 sm:$0xff]  }
 0x168   :  { %1136 = vmatprep.subr.bf16.mxu1 %v2290_v47  ;;  %v2419_v47 = vld [vmem:[%s2651_s4 + $0x28] sm:$0xff]  }
 0x16b   :  { %1137 = vmatpush1.bf16.msra.mxu1 %v2288_v50  ;;  %v2375_v50 = vld [vmem:[#allocation4 + $0x150] ss:$8 sps:$4 sm:$0xff]  }
 0x16c   :  { %1138 = vmatprep.subr.bf16.mxu1 %v2293_v51  ;;  %v2380_v51 = vld [vmem:[#allocation4 + $0x164] ss:$8 sps:$4 sm:$0xff]  }
 0x16f   :  { %1139 = vmatpush1.bf16.msra.mxu1 %v2291_v54  ;;  %v2381_v54 = vld [vmem:[#allocation4 + $0x170] ss:$8 sps:$4 sm:$0xff]  }
 0x170   :  { %1140 = vmatprep.subr.bf16.mxu1 %v2296_v55  ;;  %v2386_v55 = vld [vmem:[#allocation4 + $0x184] ss:$8 sps:$4 sm:$0xff]  }
 0x173   :  { %1141 = vmatpush1.bf16.msra.mxu1 %v2294_v57  ;;  %v2389_v57 = vld [vmem:[#allocation4 + $0x194] ss:$8 sps:$4 sm:$0xff]  }
 0x174   :  { %1142 = vmatprep.subr.bf16.mxu1 %v2299_v58  ;;  %v2387_v58 = vld [vmem:[#allocation4 + $0x190] ss:$8 sps:$4 sm:$0xff]  }
 0x177   :  { %1143 = vmatpush1.bf16.msra.mxu1 %v2297_v59  ;;  %v2392_v59 = vld [vmem:[#allocation4 + $0x1a4] ss:$8 sps:$4 sm:$0xff]  }
 0x178   :  { %1144 = vmatprep.subr.bf16.mxu1 %v2302_v60  ;;  %v2390_v60 = vld [vmem:[#allocation4 + $0x1a0] ss:$8 sps:$4 sm:$0xff]  }
 0x17b   :  { %1145 = vmatpush1.bf16.msra.mxu1 %v2300_v61  ;;  %v2395_v61 = vld [vmem:[#allocation4 + $0x1b4] ss:$8 sps:$4 sm:$0xff]  }
 0x17c   :  { %1146 = vmatprep.subr.bf16.mxu1 %v2305_v62  ;;  %v2393_v62 = vld [vmem:[#allocation4 + $0x1b0] ss:$8 sps:$4 sm:$0xff]  }
 0x17f   :  { %1147 = vmatpush1.bf16.msra.mxu1 %v2303_v63  ;;  %v2398_v63 = vld [vmem:[#allocation4 + $0x1c4] ss:$8 sps:$4 sm:$0xff]  }
 0x180   :  { %1148 = vmatprep.subr.bf16.mxu1 %v2308_v0  ;;  %v2396_v0 = vld [vmem:[#allocation4 + $0x1c0] ss:$8 sps:$4 sm:$0xff]  }
 0x183   :  { %1149 = vmatpush1.bf16.msra.mxu1 %v2306_v1  ;;  %v2401_v1 = vld [vmem:[#allocation4 + $0x1d4] ss:$8 sps:$4 sm:$0xff]  }
 0x184   :  { %1150 = vmatprep.subr.bf16.mxu1 %v2311_v2  ;;  %v2399_v2 = vld [vmem:[#allocation4 + $0x1d0] ss:$8 sps:$4 sm:$0xff]  }
 0x187   :  { %1151 = vmatpush1.bf16.msra.mxu1 %v2309_v3  ;;  %v2404_v3 = vld [vmem:[#allocation4 + $0x1e4] ss:$8 sps:$4 sm:$0xff]  }
 0x188   :  { %2061 = vmatprep.subr.bf16.mxu1 %v2408_v20 }
 0x18a   :  { %1153 = vmatmul.mubr.bf16.vlgmr.msra.gmra.mrb[4].mxu1 %v2572_v37 }
 0x18b   :  { %2062 = vmatpush3.bf16.msra.mxu1 %v2409_v21 }
 0x18c   :  { %2063 = vmatprep.subr.bf16.mxu1 %v2410_v22  ;;  %v2420_v22 = vld [vmem:[%s2651_s4 + $0x70] sm:$0xff]  }
 0x18f   :  { %2064 = vmatpush3.bf16.msra.mxu1 %v2411_v29 }
 0x190   :  { %2065 = vmatprep.subr.bf16.mxu1 %v2412_v30 }
 0x193   :  { %2066 = vmatpush3.bf16.msra.mxu1 %v2413_v35 }
 0x194   :  { %2067 = vmatprep.subr.bf16.mxu1 %v2414_v36 }
 0x197   :  { %2068 = vmatpush3.bf16.msra.mxu1 %v2415_v40 }
 0x198   :  { %2069 = vmatprep.subr.bf16.mxu1 %v2416_v39 }
 0x19b   :  { %2070 = vmatpush3.bf16.msra.mxu1 %v2417_v43 }
 0x19c   :  { %2071 = vmatprep.subr.bf16.mxu1 %v2418_v44 }
 0x19f   :  { %2072 = vmatpush3.bf16.msra.mxu1 %v2419_v47 }
 0x1a0   :  { %2073 = vmatprep.subr.bf16.mxu1 %v2420_v22 }
 0x1dd   :  { %v1031_v9 = vpop.f32.mrb[0].mxu1 }
 0x1de   :  { %v1033_v11 = vpop.f32.mrb[1].mxu1  ;;  %v1032_v16 = vadd.f32 %v1031_v9, %v344_v13  ;;  %v339_v9 = vunpack.c.l.bf16 %v336_v7 }
 0x1df   :  { %v1035_v12 = vpop.f32.mrb[2].mxu1  ;;  %v1034_v17 = vadd.f32 %v1033_v11, %v348_v15 }
 0x1e0   :  { %v1036_v14 = vpop.f32.mrb[3].mxu1  ;;  %v352_v11 = vrot.slane %v339_v9, %v2581_v8  ;;  %v356_v12 = vrot.slane %v340_v10, %v2581_v8 }
 0x1e5   :  { %v1072_v18 = vpop.f32.mrb[8].mxu0 }
 0x1e6   :  { %v1073_v19 = vadd.f32 %v1072_v18, %v1032_v16  ;;  %v1074_v37 = vpop.f32.mrb[9].mxu0 }
 0x1e7   :  { %v1075_v23 = vadd.f32 %v1074_v37, %v1034_v17  ;;  %v1076_v24 = vpop.f32.mrb[10].mxu0 }
 0x1e8   :  { %v1161_v25 = vmax.f32 %v1073_v19, 0.0  ;;  %v1077_v26 = vpop.f32.mrb[11].mxu0  ;;  %v2422_v24 = vld [vmem:[%s2651_s4 + $0x78] sm:$0xff]  }
 0x1e9   :  { %v1162_v28 = vmax.f32 %v1075_v23, 0.0  ;;  %v2421_v23 = vld [vmem:[%s2651_s4 + $0x30] sm:$0xff]  }
 0x1ea   :  { %v1165_v33 = vpack.c.bf16 %v1161_v25, %v1161_v25  ;;  %2074 = vmatpush3.bf16.msra.mxu1 %v2421_v23  ;;  %v2423_v25 = vld [vmem:[%s2651_s4 + $0x38] sm:$0xff]   ;;  %v1233_v26 = vld [vmem:[#allocation4 + $0x200] sm:$0x11] }
 0x1eb   :  { %v1166_v31 = vpack.c.bf16 %v1162_v28, %v1162_v28  ;;  %2075 = vmatprep.subr.bf16.mxu1 %v2422_v24  ;;  %v1234_v28 = vunpack.c.l.bf16 %v1233_v26  ;;  %v1235_v29 = vunpack.c.h.bf16 %v1233_v26 }
 0x1ed   :  { %1596 = vmatprep.mubr.bf16.mxu0 %v1166_v31  ;;  %v1239_v30 = vrot.slane %v1234_v28, %v2581_v8  ;;  %v1243_v31 = vrot.slane %v1235_v29, %v2581_v8 }
 0x1ee   :  { %1597 = vmatmul.mubr.bf16.vlgmr.msra.gmra.mrb[12].mxu0 %v1165_v33  ;;  %2076 = vmatpush3.bf16.msra.mxu1 %v2423_v25 }
 0x1ef   :  { %1606 = vmatpush1.bf16.msra.mxu0 %v2360_v32 }
 0x1f0   :  { %1607 = vmatprep.subr.bf16.mxu0 %v2365_v34 }
 0x1f3   :  { %1608 = vmatpush1.bf16.msra.mxu0 %v2363_v38 }
 0x1f4   :  { %1609 = vmatprep.subr.bf16.mxu0 %v2368_v27 }
 0x1f7   :  { %1610 = vmatpush1.bf16.msra.mxu0 %v2366_v41 }
 0x1f8   :  { %1611 = vmatprep.subr.bf16.mxu0 %v2371_v42  ;;  %v1682_v42 = vld [vmem:[%s2651_s4 + $0x80] sm:$0x1] }
 0x1f9   :  { %v1683_v43 = vunpack.c.l.bf16 %v1682_v42 }
 0x1fb   :  { %1612 = vmatpush1.bf16.msra.mxu0 %v2369_v45  ;;  %v1687_v45 = vrot.slane %v1683_v43, %v2581_v8 }
 0x1fc   :  { %1613 = vmatprep.subr.bf16.mxu0 %v2374_v46 }
 0x1ff   :  { %1614 = vmatpush1.bf16.msra.mxu0 %v2372_v48 }
 0x200   :  { %1615 = vmatprep.subr.bf16.mxu0 %v2377_v49 }
 0x203   :  { %1616 = vmatpush1.bf16.msra.mxu0 %v2375_v50 }
 0x204   :  { %1617 = vmatprep.subr.bf16.mxu0 %v2380_v51 }
 0x207   :  { %1618 = vmatpush1.bf16.msra.mxu0 %v2378_v52 }
 0x208   :  { %1619 = vmatprep.subr.bf16.mxu0 %v2383_v53 }
 0x20b   :  { %1620 = vmatpush1.bf16.msra.mxu0 %v2381_v54 }
 0x20c   :  { %1621 = vmatprep.subr.bf16.mxu0 %v2386_v55 }
 0x20f   :  { %1622 = vmatpush1.bf16.msra.mxu0 %v2384_v56 }
 0x210   :  { %1623 = vmatprep.subr.bf16.mxu0 %v2389_v57 }
 0x213   :  { %1624 = vmatpush1.bf16.msra.mxu0 %v2387_v58 }
 0x214   :  { %1625 = vmatprep.subr.bf16.mxu0 %v2392_v59 }
 0x217   :  { %1626 = vmatpush1.bf16.msra.mxu0 %v2390_v60 }
 0x218   :  { %1627 = vmatprep.subr.bf16.mxu0 %v2395_v61 }
 0x21b   :  { %1628 = vmatpush1.bf16.msra.mxu0 %v2393_v62 }
 0x21c   :  { %1629 = vmatprep.subr.bf16.mxu0 %v2398_v63 }
 0x21f   :  { %1630 = vmatpush1.bf16.msra.mxu0 %v2396_v0 }
 0x220   :  { %1631 = vmatprep.subr.bf16.mxu0 %v2401_v1 }
 0x223   :  { %1632 = vmatpush1.bf16.msra.mxu0 %v2399_v2 }
 0x224   :  { %1633 = vmatprep.subr.bf16.mxu0 %v2404_v3 }
 0x227   :  { %1634 = vmatpush1.bf16.msra.mxu0 %v2402_v4 }
 0x228   :  { %1635 = vmatprep.subr.bf16.mxu0 %v2407_v5 }
 0x22b   :  { %1636 = vmatpush1.bf16.msra.mxu0 %v2405_v6 }
 0x25d   :  { %v1154_v13 = vpop.f32.mrb[4].mxu1 }
 0x25e   :  { %v2087_v14 = vadd.f32 %v1154_v13, %v352_v11  ;;  %v1156_v15 = vpop.f32.mrb[5].mxu1 }
 0x25f   :  { %v2088_v16 = vadd.f32 %v1156_v15, %v356_v12  ;;  %v1158_v17 = vpop.f32.mrb[6].mxu1 }
 0x260   :  { %v1163_v18 = vmax.f32 %v2087_v14, 0.0  ;;  %v1159_v19 = vpop.f32.mrb[7].mxu1 }
 0x261   :  { %v1164_v37 = vmax.f32 %v2088_v16, 0.0 }
 0x262   :  { %v1167_v21 = vpack.c.bf16 %v1163_v18, %v1163_v18 }
 0x263   :  { %v1168_v20 = vpack.c.bf16 %v1164_v37, %v1164_v37 }
 0x265   :  { %1637 = vmatprep.mubr.bf16.mxu0 %v1168_v20 }
 0x266   :  { %1638 = vmatmul.mubr.bf16.vlgmr.msra.gmra.mrb[12].mxu0 %v1167_v21 }
 0x339   :  { %v1639_v32 = vpop.f32.mrb[12].mxu0 }
 0x33a   :  { %v2089_v33 = vadd.f32 %v1639_v32, %v1239_v30  ;;  %v1641_v34 = vpop.f32.mrb[13].mxu0 }
 0x33b   :  { %v2090_v35 = vadd.f32 %v1641_v34, %v1243_v31  ;;  %v1643_v36 = vpop.f32.mrb[14].mxu0 }
 0x33c   :  { %v1646_v38 = vmax.f32 %v2089_v33, 0.0  ;;  %v1644_v27 = vpop.f32.mrb[15].mxu0 }
 0x33d   :  { %v1647_v40 = vmax.f32 %v2090_v35, 0.0 }
 0x33e   :  { %v1648_v41 = vpack.c.bf16 %v1646_v38, %v1646_v38 }
 0x33f   :  { %v1649_v39 = vpack.c.bf16 %v1647_v40, %v1647_v40 }
 0x341   :  { %1816 = vmatprep.mubr.bf16.mxu1 %v1649_v39 }
 0x342   :  { %1817 = vmatmul.mubr.bf16.vlgmr.msra.gmra.mrb[8].mxu1 %v1648_v41 }
 0x415   :  { %v2077_v44 = vpop.f32.mrb[8].mxu1 }
 0x416   :  { %v2078_v46 = vpop.f32.mrb[9].mxu1 }
 0x417   :  { %v2079_v47 = vadd.f32 %v2078_v46, %v2077_v44  ;;  %v2080_v48 = vpop.f32.mrb[10].mxu1 }
 0x418   :  { %v2081_v49 = vpop.f32.mrb[11].mxu1 }
 0x419   :  { %v1819_v50 = vadd.f32 %v2079_v47, %v1687_v45 }
 0x41b   :  { %v1826_v51 = vmax.f32 %v1819_v50, -20.0  ;;  %1825 = vst.msk [vmem:[%s2652_s5] sm:$0xff] %vm1824_vm3, %v1819_v50 }
 0x41d   :  { %v1827_v52 = vmin.f32 %v1826_v51, 2.0 }
 0x41f   :  { %1829 = vrot.lane.b32.xlu0 %v1827_v52, %s2480_s22 }
 0x491   :  { %v1830_v53 = vpop.permute.xlu0 %1829 }
 0x492   :  { %1832 = vst.msk [vmem:[%s2653_s6] sm:$0xff] %vm1824_vm3, %v1830_v53 }
 0x493   :  { %1841 = vsyncpa [#allocation3], 1 }
 0x494   :  { %1842 = vsyncpa [#allocation5], 1 }

</bundles_post_ra>
